<compile_context>
chip_gen: v6e
topology: v6e:2x2x1
jax: 0.10.0
libtpu: 0.0.40
codegen_flags: <defaults>
</compile_context>

<pallas_src>
import functools

import jax
import jax.numpy as jnp
from jax.experimental import pallas as pl
from jax.experimental.pallas import tpu as pltpu


_INV_SQRT2 = 0.7071067811865476


# -----------------------------------------------------------------------------
# Small helpers
# -----------------------------------------------------------------------------

def _round_up(n, m):
    return ((n + m - 1) // m) * m


def _pick_tile(n, target, mult=1):
    """Largest tile <= target dividing n (multiple of `mult` when splitting);
    falls back to the full dimension, which is always a legal block."""
    if n <= target:
        return n
    for d in range(target, 0, -1):
        if n % d == 0 and d % mult == 0:
            return d
    return n


def _erf_approx(x):
    # Abramowitz & Stegun 7.1.26, |err| < 1.5e-7 (~f32 eps); used for exact GELU.
    a1, a2, a3, a4, a5 = 0.254829592, -0.284496736, 1.421413741, -1.453152027, 1.061405429
    p = 0.3275911
    s = jnp.sign(x)
    ax = jnp.abs(x)
    t = 1.0 / (1.0 + p * ax)
    poly = ((((a5 * t + a4) * t + a3) * t + a2) * t + a1) * t
    return s * (1.0 - poly * jnp.exp(-ax * ax))


def _gelu_exact(x):
    return 0.5 * x * (1.0 + _erf_approx(x * _INV_SQRT2))


def _vmem_cap_bytes():
    """~80% of this generation's physical VMEM (64 MiB/TC on v7x, 128 MiB v5e/v6e)."""
    cap = None
    try:
        cap = getattr(pltpu.get_tpu_info(), "vmem_capacity_bytes", None)
    except Exception:
        cap = None
    if not cap:
        cap = 64 << 20          # conservative fallback = v7x per-core capacity
    return int(cap * 0.8)


# -----------------------------------------------------------------------------
# Kernels
# -----------------------------------------------------------------------------

def _slstm_block_kernel(g0_ref, xres_ref, bias_r_ref, gamma_ref, beta_ref,
                        wproj_ref, bproj_ref, w_hbm,
                        out_ref,
                        h_scr, c_scr, w_vmem, y_scr, copy_sem,
                        *, num_layers, hidden_size, unroll):
    """One time-chunk of the stacked sLSTM + fused block epilogue.

    grid axis 0 = time chunks (sequential).  h/c state and the bf16 stacked
    recurrent weights live in VMEM scratch across grid steps; the weights are
    DMA'd from HBM exactly once (single DMA, single-buffered) at chunk 0.
    """
    L = num_layers
    H = hidden_size
    t_chunk, B, _ = y_scr.shape

    @pl.when(pl.program_id(0) == 0)
    def _():
        # Start the stacked-weight DMA first so the h/c zero-fill hides part of
        # its latency; wait just before the weights are first used.
        cp = pltpu.make_async_copy(w_hbm, w_vmem, copy_sem.at[0])
        cp.start()
        h_scr[...] = jnp.zeros_like(h_scr)
        c_scr[...] = jnp.zeros_like(c_scr)
        cp.wait()
        # TODO(synk): cross-pallas_call prefetch (P10) of the next block's weights
        # behind the preceding linear_pallas(g0) call is not implemented.

    def step(t, carry):
        x = None
        for l in range(L):                       # static unroll over layers
            h = h_scr[l]                         # (B, H) f32
            c = c_scr[l]
            if l == 0:
                # Layer-0 input projection was hoisted out of the recurrence and
                # streamed in as bf16; only the recurrent matmul remains here.
                rec = jnp.dot(h.astype(jnp.bfloat16), w_vmem[0:H, :],
                              preferred_element_type=jnp.float32)
                gates = g0_ref[t].astype(jnp.float32) + rec
            else:
                # Fused input+recurrent matmul: one (B,2H) @ (2H,4H) MXU launch
                # on the lane-concatenated [x | h].
                row0 = H + 2 * (l - 1) * H
                xh = jnp.concatenate(
                    [x.astype(jnp.bfloat16), h.astype(jnp.bfloat16)], axis=-1)
                gates = (jnp.dot(xh, w_vmem[row0:row0 + 2 * H, :],
                                 preferred_element_type=jnp.float32)
                         + bias_r_ref[l - 1])
            # Gate nonlinearities / state math stay in f32 (safe on v5e/v6e/v7x).
            # NOTE: gate slices are H-wide; keep H a multiple of 128 for lane-
            # aligned slices on non-toy configs.
            i_g = jnp.exp(gates[:, 0 * H:1 * H])
            f_g = jnp.exp(gates[:, 1 * H:2 * H])
            g_g = jnp.tanh(gates[:, 2 * H:3 * H])
            o_g = jax.nn.sigmoid(gates[:, 3 * H:4 * H])
            c = f_g * c + i_g * g_g
            h = o_g * jnp.tanh(c)
            h_scr[l] = h
            c_scr[l] = c
            x = h
        y_scr[t] = x
        return carry

    jax.lax.fori_loop(0, t_chunk, step, 0, unroll=unroll)

    # Fused chunk epilogue: GELU(exact) -> LayerNorm (one pass) -> Linear(H->E)
    # -> +residual, applied to the whole (t_chunk*B, H) slab (one MXU matmul).
    y = y_scr[...].reshape(t_chunk * B, H)
    a = _gelu_exact(y)
    mean = jnp.mean(a, axis=-1, keepdims=True)
    msq = jnp.mean(a * a, axis=-1, keepdims=True)
    var = jnp.maximum(msq - mean * mean, 0.0)
    n = (a - mean) * jax.lax.rsqrt(var + 1e-5)
    n = n * gamma_ref[...] + beta_ref[...]
    proj = jnp.dot(n.astype(jnp.bfloat16), wproj_ref[...],
                   preferred_element_type=jnp.float32) + bproj_ref[...]
    out = proj + xres_ref[...].reshape(t_chunk * B, -1)
    out_ref[...] = out.reshape(t_chunk, B, -1)


def _linear_kernel(x_ref, w_ref, b_ref, out_ref):
    x = x_ref[...].astype(w_ref.dtype)            # bf16 MXU operands
    acc = jnp.dot(x, w_ref[...], preferred_element_type=jnp.float32) + b_ref[...]
    out_ref[...] = acc.astype(out_ref.dtype)


# -----------------------------------------------------------------------------
# Pallas wrappers
# -----------------------------------------------------------------------------

def linear_pallas(x, w, b, *, out_dtype=jnp.float32, tn_target=256, tv_target=512):
    """Tiled y = x @ w + b.  x: (N, E); w: (E, V) bf16; b: (1, V) f32."""
    N, E = x.shape
    _, V = w.shape
    TN = _pick_tile(N, tn_target, mult=8)
    TV = _pick_tile(V, tv_target, mult=128)
    x_item = jnp.dtype(x.dtype).itemsize
    w_item = jnp.dtype(w.dtype).itemsize
    out_item = jnp.dtype(out_dtype).itemsize
    cap = _vmem_cap_bytes()
    need = 2 * (TN * E * x_item + E * TV * w_item + TV * 4 + TN * TV * out_item) + (4 << 20)
    vmem_limit = int(min(max(need, 16 << 20), cap))

    # Stream the larger operand from HBM only once (it owns the outer grid axis
    # and stays resident while the inner axis sweeps).
    if E * V * w_item > N * E * x_item:
        grid = (V // TV, N // TN)
        in_specs = [
            pl.BlockSpec((TN, E), lambda j, i: (i, 0)),
            pl.BlockSpec((E, TV), lambda j, i: (0, j)),
            pl.BlockSpec((1, TV), lambda j, i: (0, j)),
        ]
        out_spec = pl.BlockSpec((TN, TV), lambda j, i: (i, j))
    else:
        grid = (N // TN, V // TV)
        in_specs = [
            pl.BlockSpec((TN, E), lambda i, j: (i, 0)),
            pl.BlockSpec((E, TV), lambda i, j: (0, j)),
            pl.BlockSpec((1, TV), lambda i, j: (0, j)),
        ]
        out_spec = pl.BlockSpec((TN, TV), lambda i, j: (i, j))

    return pl.pallas_call(
        _linear_kernel,
        out_shape=jax.ShapeDtypeStruct((N, V), out_dtype),
        grid_spec=pltpu.PrefetchScalarGridSpec(
            num_scalar_prefetch=0,
            grid=grid,
            in_specs=in_specs,
            out_specs=out_spec,
        ),
        compiler_params=pltpu.CompilerParams(
            dimension_semantics=("parallel", "parallel"),
            vmem_limit_bytes=vmem_limit),
    )(x, w, b)


def _slstm_vmem_bytes(t_chunk, B, E, H, L):
    f32, bf16 = 4, 2
    Lr = max(L - 1, 1)
    io = 2 * (t_chunk * B * 4 * H * bf16             # g0 chunk (bf16, double-buffered)
              + t_chunk * B * E * f32                # residual chunk in
              + t_chunk * B * E * f32)               # block output chunk
    consts = 2 * (Lr * 4 * H * f32 + 2 * H * f32 + H * E * bf16 + E * f32)
    scratch = (2 * L * B * H * f32                   # h, c state
               + (2 * L - 1) * H * 4 * H * bf16      # stacked weights (single-buffered)
               + t_chunk * B * H * f32)              # y chunk
    return io + consts + scratch + (8 << 20)         # headroom for compiler internals


def slstm_block_pallas(x_tbe, g0, w_stack, bias_rest, ln_gamma, ln_beta,
                       proj_w, proj_b, *, num_layers, t_chunk, vmem_limit):
    """x_tbe: (T,B,E) f32 block input; g0: (T,B,4H) bf16 precomputed layer-0 gates;
    w_stack: ((2L-1)*H, 4H) bf16 = [whh_0; wih_1; whh_1; ...]."""
    T, B, E = x_tbe.shape
    rows, H4 = w_stack.shape
    H = H4 // 4
    L = num_layers
    Lr = bias_rest.shape[0]
    assert rows == (2 * L - 1) * H and T % t_chunk == 0
    unroll = t_chunk if t_chunk <= 8 else 4           # partial unroll for big chunks
    kernel = functools.partial(_slstm_block_kernel, num_layers=L,
                               hidden_size=H, unroll=unroll)
    return pl.pallas_call(
        kernel,
        out_shape=jax.ShapeDtypeStruct((T, B, E), jnp.float32),
        grid_spec=pltpu.PrefetchScalarGridSpec(
            num_scalar_prefetch=0,
            grid=(T // t_chunk,),
            in_specs=[
                pl.BlockSpec((t_chunk, B, 4 * H), lambda t: (t, 0, 0)),   # g0 (bf16)
                pl.BlockSpec((t_chunk, B, E), lambda t: (t, 0, 0)),       # residual
                pl.BlockSpec((Lr, 1, 4 * H), lambda t: (0, 0, 0)),        # bias l>=1
                pl.BlockSpec((1, H), lambda t: (0, 0)),                   # ln gamma
                pl.BlockSpec((1, H), lambda t: (0, 0)),                   # ln beta
                pl.BlockSpec((H, E), lambda t: (0, 0)),                   # proj W (bf16)
                pl.BlockSpec((1, E), lambda t: (0, 0)),                   # proj b
                pl.BlockSpec(memory_space=pl.ANY),                        # stacked weights (HBM)
            ],
            out_specs=pl.BlockSpec((t_chunk, B, E), lambda t: (t, 0, 0)),
            scratch_shapes=[
                pltpu.VMEM((L, B, H), jnp.float32),                  # h state
                pltpu.VMEM((L, B, H), jnp.float32),                  # c state
                pltpu.VMEM(((2 * L - 1) * H, 4 * H), jnp.bfloat16),  # stacked weights
                pltpu.VMEM((t_chunk, B, H), jnp.float32),            # y chunk
                pltpu.SemaphoreType.DMA((1,)),
            ],
        ),
        compiler_params=pltpu.CompilerParams(
            dimension_semantics=("arbitrary",),
            vmem_limit_bytes=vmem_limit,
        ),
    )(g0, x_tbe, bias_rest, ln_gamma, ln_beta, proj_w, proj_b, w_stack)
    # TODO(synk): v7x dual-TensorCore batch split (leading "parallel" grid axis with
    # per-core h/c scratch + duplicated weights) not implemented; single-core time
    # grid is used on all generations.


# -----------------------------------------------------------------------------
# Parameter construction (deterministic; matches the module's shapes & init intent)
# -----------------------------------------------------------------------------

def _xavier_uniform(key, out_dim, in_dim):
    bound = (6.0 / (in_dim + out_dim)) ** 0.5
    return jax.random.uniform(key, (out_dim, in_dim), jnp.float32, -bound, bound)


def _linear_default(key, out_dim, in_dim):
    kw, kb = jax.random.split(key)
    bound = 1.0 / (in_dim ** 0.5)
    w = jax.random.uniform(kw, (out_dim, in_dim), jnp.float32, -bound, bound)
    b = jax.random.uniform(kb, (out_dim,), jnp.float32, -bound, bound)
    return w, b


def make_params(key, vocab_size, embedding_size, hidden_size, num_layers, num_blocks):
    E, H, L = embedding_size, hidden_size, num_layers
    Lr = max(L - 1, 1)
    keys = jax.random.split(key, 2 + num_blocks)
    params = {
        "embedding": jax.random.normal(keys[0], (vocab_size, E), jnp.float32),
        "num_layers": L,
        "hidden_size": H,
    }

    blocks = []
    for b in range(num_blocks):
        bkeys = jax.random.split(keys[2 + b], 2 * L + 1)
        wih, whh = [], []
        for l in range(L):
            din = E if l == 0 else H
            wih.append(_xavier_uniform(bkeys[2 * l], 4 * H, din).T)      # (din, 4H)
            whh.append(_xavier_uniform(bkeys[2 * l + 1], 4 * H, H).T)    # (H, 4H)
        pw, pb = _linear_default(bkeys[-1], E, H)                        # proj: H -> E
        rows = [whh[0]]
        for l in range(1, L):
            rows.append(wih[l])
            rows.append(whh[l])
        w_stack = jnp.concatenate(rows, axis=0)                          # ((2L-1)H, 4H)
        blocks.append({
            "wih0": wih[0].astype(jnp.bfloat16),                         # (E, 4H)
            "w_stack": w_stack.astype(jnp.bfloat16),                     # ((2L-1)H, 4H)
            "bias0": jnp.zeros((1, 4 * H), jnp.float32),                 # reset_parameters zeros bias
            "bias_rest": jnp.zeros((Lr, 1, 4 * H), jnp.float32),
            "ln_gamma": jnp.ones((1, H), jnp.float32),
            "ln_beta": jnp.zeros((1, H), jnp.float32),
            "proj_w": pw.T.astype(jnp.bfloat16),                         # (H, E)
            "proj_b": pb.reshape(1, E),
        })
    params["blocks"] = blocks

    ow, ob = _linear_default(keys[1], vocab_size, E)                     # output: E -> V
    params["out_w"] = ow.T.astype(jnp.bfloat16)                          # (E, V)
    # TODO(synk): optional fp8 quantization of out_w for v7x MXU not implemented.
    params["out_b"] = ob.reshape(1, vocab_size)
    return params


# -----------------------------------------------------------------------------
# Forward passes
# -----------------------------------------------------------------------------

def xlstm_forward_pallas(tokens, params, *, t_chunk_target=32):
    emb = params["embedding"][tokens]                 # (B, T, E) gather kept in JAX glue
    B, T, E = emb.shape
    L = params["num_layers"]
    H = params["hidden_size"]

    # Pad batch to >=16 (bf16 sublane packing); MXU M-dim = B so larger real
    # batches are nearly free up to the MXU height.
    B_pad = max(_round_up(B, 16), 16)

    # Time chunking with generation-aware VMEM budget; pad T up to a multiple of
    # the chunk instead of collapsing the chunk for awkward lengths.
    cap = _vmem_cap_bytes()
    t_chunk = min(t_chunk_target, T)
    while t_chunk > 8 and _slstm_vmem_bytes(t_chunk, B_pad, E, H, L) > cap:
        t_chunk //= 2
    T_pad = _round_up(T, t_chunk)
    vmem_limit = int(min(max(_slstm_vmem_bytes(t_chunk, B_pad, E, H, L), 32 << 20), cap))

    x = jnp.transpose(emb, (1, 0, 2))                 # (T, B, E) time-major
    x = jnp.pad(x, ((0, T_pad - T), (0, B_pad - B), (0, 0)))

    for blk in params["blocks"]:
        # Layer-0 input projection hoisted out of the recurrence: one big tiled MXU
        # matmul; result streamed as bf16 (dominant HBM stream of the recurrence).
        g0 = linear_pallas(x.reshape(T_pad * B_pad, E), blk["wih0"], blk["bias0"],
                           out_dtype=jnp.bfloat16)
        g0 = g0.reshape(T_pad, B_pad, 4 * H)
        x = slstm_block_pallas(x, g0, blk["w_stack"], blk["bias_rest"],
                               blk["ln_gamma"], blk["ln_beta"],
                               blk["proj_w"], blk["proj_b"],
                               num_layers=L, t_chunk=t_chunk,
                               vmem_limit=vmem_limit)

    V = params["out_w"].shape[1]
    logits = linear_pallas(x.reshape(T_pad * B_pad, E), params["out_w"],
                           params["out_b"]).reshape(T_pad, B_pad, V)
    logits = jnp.transpose(logits, (1, 0, 2))         # (B_pad, T_pad, V)
    return logits[:B, :T]


def xlstm_forward_ref(tokens, params):
    """Pure-JAX reference mirroring the PyTorch module semantics (and the same
    bf16-matmul / f32-accumulate / bf16-g0 precision choices as the Pallas path)."""
    x = params["embedding"][tokens]                   # (B, T, E) f32
    B, T, E = x.shape
    L = params["num_layers"]
    H = params["hidden_size"]
    for blk in params["blocks"]:
        w_stack = blk["w_stack"]
        g0 = (jnp.dot(x.reshape(B * T, E).astype(jnp.bfloat16), blk["wih0"],
                      preferred_element_type=jnp.float32)
              + blk["bias0"]).astype(jnp.bfloat16).reshape(B, T, 4 * H)
        h = [jnp.zeros((B, H), jnp.float32) for _ in range(L)]
        c = [jnp.zeros((B, H), jnp.float32) for _ in range(L)]
        outs = []
        for t in range(T):
            xt = x[:, t, :]
            for l in range(L):
                if l == 0:
                    rec = jnp.dot(h[0].astype(jnp.bfloat16), w_stack[0:H],
                                  preferred_element_type=jnp.float32)
                    gates = g0[:, t].astype(jnp.float32) + rec
                else:
                    row0 = H + 2 * (l - 1) * H
                    xh = jnp.concatenate([xt, h[l]], axis=-1).astype(jnp.bfloat16)
                    gates = (jnp.dot(xh, w_stack[row0:row0 + 2 * H],
                                     preferred_element_type=jnp.float32)
                             + blk["bias_rest"][l - 1])
                i_g = jnp.exp(gates[:, :H])
                f_g = jnp.exp(gates[:, H:2 * H])
                g_g = jnp.tanh(gates[:, 2 * H:3 * H])
                o_g = jax.nn.sigmoid(gates[:, 3 * H:])
                c[l] = f_g * c[l] + i_g * g_g
                h[l] = o_g * jnp.tanh(c[l])
                xt = h[l]
            outs.append(xt)
        y = jnp.stack(outs, axis=1)                   # (B, T, H)
        a = _gelu_exact(y)
        mean = a.mean(-1, keepdims=True)
        msq = (a * a).mean(-1, keepdims=True)
        var = jnp.maximum(msq - mean * mean, 0.0)
        n = (a - mean) * jax.lax.rsqrt(var + 1e-5)
        n = n * blk["ln_gamma"][0] + blk["ln_beta"][0]
        proj = (jnp.dot(n.reshape(B * T, H).astype(jnp.bfloat16), blk["proj_w"],
                        preferred_element_type=jnp.float32).reshape(B, T, E)
                + blk["proj_b"][0])
        x = proj + x
    logits = (jnp.dot(x.reshape(B * T, E).astype(jnp.bfloat16), params["out_w"],
                      preferred_element_type=jnp.float32).reshape(B, T, -1)
              + params["out_b"][0])
    return logits


# -----------------------------------------------------------------------------

if __name__ == "__main__":
    vocab_size = 64
    embedding_size = 32
    hidden_size = 32
    num_layers = 2
    num_blocks = 2
    batch, seq = 2, 8

    key = jax.random.PRNGKey(0)
    pkey, tkey = jax.random.split(key)
    params = make_params(pkey, vocab_size, embedding_size, hidden_size,
                         num_layers, num_blocks)
    tokens = jax.random.randint(tkey, (batch, seq), 0, vocab_size, dtype=jnp.int32)

    logits = xlstm_forward_pallas(tokens, params)
    logits = jax.block_until_ready(logits)
    assert logits.shape == (batch, seq, vocab_size)

    ref = xlstm_forward_ref(tokens, params)
    max_err = float(jnp.max(jnp.abs(logits - ref)))
    assert jnp.allclose(logits, ref, rtol=1e-2, atol=1e-2), max_err

    # TODO(synk): dropout is identity (p=0.0 module default); non-zero dropout would
    # need pltpu.prng_seed / stateful_bernoulli inside the kernels.
    print("KERNEL_OK")
</pallas_src>

<mosaic_0001>
module attributes {stable_mosaic.version = 11 : i64} {
  func.func @_linear_kernel(%arg0: i32, %arg1: i32, %arg2: memref<128x32xf32, #tpu.memory_space<vmem>>, %arg3: memref<32x128xbf16, #tpu.memory_space<vmem>>, %arg4: memref<1x128xf32, #tpu.memory_space<vmem>>, %arg5: memref<128x128xbf16, #tpu.memory_space<vmem>>) attributes {dimension_semantics = [#tpu.dimension_semantics<parallel>, #tpu.dimension_semantics<parallel>], iteration_bounds = array<i64: 1, 1>, scalar_prefetch = 0 : i64, scratch_operands = 0 : i64, tpu.core_type = #tpu.core_type<tc>, window_params = [{transform_indices = @transform_0, window_bounds = array<i64: 128, 32>}, {transform_indices = @transform_1, window_bounds = array<i64: 32, 128>}, {transform_indices = @transform_2, window_bounds = array<i64: 1, 128>}, {transform_indices = @transform_3, window_bounds = array<i64: 128, 128>}]} {
    %c0 = arith.constant 0 : index
    %c0_0 = arith.constant 0 : index
    %0 = vector.load %arg2[%c0, %c0_0] : memref<128x32xf32, #tpu.memory_space<vmem>>, vector<128x32xf32>
    %1 = arith.truncf %0 : vector<128x32xf32> to vector<128x32xbf16>
    %c0_1 = arith.constant 0 : index
    %c0_2 = arith.constant 0 : index
    %2 = vector.load %arg3[%c0_1, %c0_2] : memref<32x128xbf16, #tpu.memory_space<vmem>>, vector<32x128xbf16>
    %cst = arith.constant dense<0.000000e+00> : vector<128x128xf32>
    %3 = tpu.matmul %1, %2, %cst {dimension_numbers = #tpu.dot_dimension_numbers<[1], [0], [0], [1], [0, 0, 1, 1], [], []>} : vector<128x32xbf16>, vector<32x128xbf16>, vector<128x128xf32> -> vector<128x128xf32>
    %c0_3 = arith.constant 0 : index
    %c0_4 = arith.constant 0 : index
    %4 = vector.load %arg4[%c0_3, %c0_4] : memref<1x128xf32, #tpu.memory_space<vmem>>, vector<1x128xf32>
    %5 = vector.broadcast %4 : vector<1x128xf32> to vector<128x128xf32>
    %6 = arith.addf %3, %5 : vector<128x128xf32>
    %7 = arith.truncf %6 : vector<128x128xf32> to vector<128x128xbf16>
    %c0_5 = arith.constant 0 : index
    %c0_6 = arith.constant 0 : index
    %8 = vector.load %arg5[%c0_5, %c0_6] : memref<128x128xbf16, #tpu.memory_space<vmem>>, vector<128x128xbf16>
    tpu.vector_store %arg5[%c0_5, %c0_6], %7 {strides = array<i32>} : memref<128x128xbf16, #tpu.memory_space<vmem>>, vector<128x128xbf16>,
    return
  }
  func.func @transform_0(%arg0: i32, %arg1: i32) -> (i32, i32) {
    %c0_i32 = arith.constant 0 : i32
    %c0_i32_0 = arith.constant 0 : i32
    return %arg0, %c0_i32 : i32, i32
  }
  func.func @transform_1(%arg0: i32, %arg1: i32) -> (i32, i32) {
    %c0_i32 = arith.constant 0 : i32
    %c0_i32_0 = arith.constant 0 : i32
    return %c0_i32, %arg1 : i32, i32
  }
  func.func @transform_2(%arg0: i32, %arg1: i32) -> (i32, i32) {
    %c0_i32 = arith.constant 0 : i32
    %c0_i32_0 = arith.constant 0 : i32
    return %c0_i32, %arg1 : i32, i32
  }
  func.func @transform_3(%arg0: i32, %arg1: i32) -> (i32, i32) {
    %c0_i32 = arith.constant 0 : i32
    return %arg0, %arg1 : i32, i32
  }
}

</mosaic_0001>

<bundles_post_ra>
// kernel: tpu_custom_call.1
= control target key start
LH: loop header
LB: loop body
LE: loop exit
PB: predicated region body
PF: predicated region fallthrough
CT: control target
= control target key end

     0   :  { %vm63_vm0 = vcmask 261120   ;;  %s523_s0 = inlined_call_operand.vmem [shape: f32[128,32], index: 0, kind: input, shape index: {}]   ;;  %s524_s1 = inlined_call_operand.vmem [shape: bf16[32,128], index: 1, kind: input, shape index: {}]   ;;  %s525_s2 = inlined_call_operand.vmem [shape: f32[1,128], index: 2, kind: input, shape index: {}]   ;;  %s526_s3 = inlined_call_operand.hbm [shape: bf16[128,128], index: 3, kind: output, shape index: {}]  }
   0x1   :  { %v408_v0 = vld [vmem:[%s524_s1 + $0x8] sm:$0xff]   ;;  %v409_v1 = vld [vmem:[%s524_s1] sm:$0xff]   ;;  %v18_v7 = vld [vmem:[%s523_s0 + $0x10] sm:$0xff] }
   0x2   :  { %381 = vmatprep.subr.bf16.mxu0 %v408_v0  ;;  %401 = vmatprep.subr.bf16.mxu1 %v408_v0  ;;  %v16_v2 = vld [vmem:[%s523_s0] sm:$0xff]  ;;  %v17_v3 = vld [vmem:[%s523_s0 + $0x8] sm:$0xff]  ;;  %v19_v8 = vld [vmem:[%s523_s0 + $0x18] sm:$0xff] }
   0x3   :  { %v24_v4 = vld [vmem:[%s523_s0 + $0x40] sm:$0xff]  ;;  %382 = vmatpush3.bf16.msra.mxu0 %v408_v0  ;;  %403 = vmatpush3.bf16.msra.mxu1 %v408_v0  ;;  %v32_v5 = vpack.c.bf16 %v17_v3, %v16_v2  ;;  %v25_v6 = vld [vmem:[%s523_s0 + $0x48] sm:$0xff]  ;;  %v26_v10 = vld [vmem:[%s523_s0 + $0x50] sm:$0xff]  ;;  %v33_v16 = vpack.c.bf16 %v19_v8, %v18_v7 }
   0x4   :  { %383 = vmatprep.subr.bf16.mxu0 %v409_v1  ;;  %402 = vmatprep.subr.bf16.mxu1 %v409_v1  ;;  %v36_v9 = vpack.c.bf16 %v25_v6, %v24_v4  ;;  %v27_v11 = vld [vmem:[%s523_s0 + $0x58] sm:$0xff]  ;;  %v20_v12 = vld [vmem:[%s523_s0 + $0x20] sm:$0xff]  ;;  %v21_v13 = vld [vmem:[%s523_s0 + $0x28] sm:$0xff] }
   0x5   :  { %385 = vmatprep.mubr.msk.bf16.mxu0 %vm63_vm0, %v32_v5  ;;  %v28_v14 = vld [vmem:[%s523_s0 + $0x60] sm:$0xff]  ;;  %v29_v15 = vld [vmem:[%s523_s0 + $0x68] sm:$0xff]  ;;  %v37_v17 = vpack.c.bf16 %v27_v11, %v26_v10  ;;  %v34_v18 = vpack.c.bf16 %v21_v13, %v20_v12 }
   0x6   :  { %393 = vmatprep.mubr.msk.bf16.mxu1 %vm63_vm0, %v36_v9  ;;  %v38_v19 = vpack.c.bf16 %v29_v15, %v28_v14 }
   0x7   :  { %384 = vmatpush3.bf16.msra.mxu0 %v409_v1  ;;  %404 = vmatpush3.bf16.msra.mxu1 %v409_v1 }
   0x8   :  { %8 = vsyncpa [#allocation3], 0  ;;  %v22_v20 = vld [vmem:[%s523_s0 + $0x30] sm:$0xff]  ;;  %v23_v21 = vld [vmem:[%s523_s0 + $0x38] sm:$0xff] }
   0x9   :  { %v30_v22 = vld [vmem:[%s523_s0 + $0x70] sm:$0xff]  ;;  %v31_v23 = vld [vmem:[%s523_s0 + $0x78] sm:$0xff]  ;;  %v35_v24 = vpack.c.bf16 %v23_v21, %v22_v20  ;;  %v281_v28 = vld [vmem:[%s525_s2] ss:$0 sm:$0xff]  ;;  %s432_s0 = smov [#allocation2]  }
   0xa   :  { %386 = vmatmul.mubr.msk.bf16.vlgmr.msra.gmra.mxu0 %vm63_vm0, %v33_v16  ;;  %394 = vmatmul.mubr.msk.bf16.vlgmr.msra.gmra.mxu1 %vm63_vm0, %v37_v17  ;;  %v39_v25 = vpack.c.bf16 %v31_v23, %v30_v22  ;;  %s270_s2 = sshll.u32 %s432_s0, 4  ;;  %s271_s2 = int_to_ptr.vmem [resolvable:$true] %s270_s2 }
   0xb   :  { %389 = vmatprep.mubr.msk.bf16.mxu0 %vm63_vm0, %v34_v18  ;;  %397 = vmatprep.mubr.msk.bf16.mxu1 %vm63_vm0, %v38_v19  ;;  %s410_s22 = scalar_lea.vmem %s271_s2, 1024  ;;  %p415_p1 = scmp.lt.s32.totalorder %s271_s2, %s271_s2 }
   0xc   :  { %p411_p0 = scmp.ne.s32.totalorder %s271_s2, %s410_s22  ;;  %p416_p2 = scmp.lt.s32.totalorder %s410_s22, %s410_s22 }
   0xe   :  { %p417_p3 = por %p416_p2, %p415_p1 }
  0x10   :  { %p418_p4 = pnand %p417_p3, %p411_p0 }
  0x12   :  { %390 = vmatmul.mubr.msk.bf16.gmra.mxu0 %vm63_vm0, %v35_v24  ;;  %398 = vmatmul.mubr.msk.bf16.gmra.mxu1 %vm63_vm0, %v39_v25 }
  0xca   :  { %v387_v26 = vpop.f32.mrf.mxu0  ;;  %v395_v27 = vpop.f32.mrf.mxu1 }
  0xcb   :  { %v131_v33 = vadd.f32 %v387_v26, %v281_v28  ;;  %v163_v34 = vadd.f32 %v395_v27, %v281_v28 }
  0xcc   :  { %v122_v29 = vpop.f32.mrf.mxu0  ;;  %v154_v30 = vpop.f32.mrf.mxu1 }
  0xcd   :  { %v123_v37 = vadd.f32 %v281_v28, %v122_v29  ;;  %v155_v38 = vadd.f32 %v281_v28, %v154_v30 }
  0xce   :  { %v388_v31 = vpop.f32.mrf.mxu0  ;;  %v396_v32 = vpop.f32.mrf.mxu1 }
  0xcf   :  { %v134_v35 = vadd.f32 %v388_v31, %v281_v28  ;;  %v166_v36 = vadd.f32 %v396_v32, %v281_v28 }
  0xd0   :  { %v125_v39 = vpop.f32.mrf.mxu0  ;;  %v157_v40 = vpop.f32.mrf.mxu1 }
  0xd1   :  { %v332_v41 = vpack.c.bf16 %v134_v35, %v131_v33  ;;  %v352_v42 = vpack.c.bf16 %v166_v36, %v163_v34  ;;  %v126_v43 = vadd.f32 %v281_v28, %v125_v39  ;;  %v158_v44 = vadd.f32 %v281_v28, %v157_v40 }
  0xd2   :  { %v391_v45 = vpop.f32.mrf.mxu0  ;;  %v399_v46 = vpop.f32.mrf.mxu1 }
  0xd3   :  { %364 = vst [vmem:[#allocation2 + $0x8] sm:$0xff] %v332_v41   ;;  %368 = vst [vmem:[#allocation2 + $0x28] sm:$0xff] %v352_v42   ;;  %v327_v47 = vpack.c.bf16 %v126_v43, %v123_v37  ;;  %v347_v48 = vpack.c.bf16 %v158_v44, %v155_v38  ;;  %v147_v53 = vadd.f32 %v391_v45, %v281_v28 }
  0xd4   :  { %v138_v49 = vpop.f32.mrf.mxu0  ;;  %v170_v50 = vpop.f32.mrf.mxu1  ;;  %v179_v54 = vadd.f32 %v399_v46, %v281_v28 }
  0xd5   :  { %328 = vst [vmem:[#allocation2] sm:$0xff] %v327_v47   ;;  %367 = vst [vmem:[#allocation2 + $0x20] sm:$0xff] %v347_v48   ;;  %v139_v57 = vadd.f32 %v281_v28, %v138_v49  ;;  %v171_v58 = vadd.f32 %v281_v28, %v170_v50 }
  0xd6   :  { %v392_v51 = vpop.f32.mrf.mxu0  ;;  %v400_v52 = vpop.f32.mrf.mxu1 }
  0xd7   :  { %v150_v55 = vadd.f32 %v392_v51, %v281_v28  ;;  %v182_v56 = vadd.f32 %v400_v52, %v281_v28 }
  0xd8   :  { %v141_v59 = vpop.f32.mrf.mxu0  ;;  %v173_v60 = vpop.f32.mrf.mxu1 }
  0xd9   :  { %v342_v61 = vpack.c.bf16 %v150_v55, %v147_v53  ;;  %v362_v62 = vpack.c.bf16 %v182_v56, %v179_v54  ;;  %v142_v63 = vadd.f32 %v281_v28, %v141_v59  ;;  %v174_v0 = vadd.f32 %v281_v28, %v173_v60 }
  0xdb   :  { %366 = vst [vmem:[#allocation2 + $0x18] sm:$0xff] %v342_v61   ;;  %370 = vst [vmem:[#allocation2 + $0x38] sm:$0xff] %v362_v62   ;;  %v337_v1 = vpack.c.bf16 %v142_v63, %v139_v57  ;;  %v357_v2 = vpack.c.bf16 %v174_v0, %v171_v58 }
  0xdd   :  { %365 = vst [vmem:[#allocation2 + $0x10] sm:$0xff] %v337_v1   ;;  %369 = vst [vmem:[#allocation2 + $0x30] sm:$0xff] %v357_v2  }
  0xde   :  { %421 = shalt.err (!%p418_p4)
}
  0xdf   :  { %s433_s1 = smov 64   ;;  %s434_s23 = smov 4  }
  0xe0   :  { %276 = dma.vmem_to_hbm [thread:$0]  %s271_s2, 1024, %s526_s3, [#allocation3], %s433_s1, %s433_s1, %s434_s23  }
  0xe1   :  { %430 = dma.done.wait [#allocation3], 1024  }
  0xe2   :  { %431 = vsyncadd [#allocation3], 4294966272 }
  0xe3   :  { %280 = vsyncpa [#allocation3], 1 }

</bundles_post_ra>
